<compile_context>
chip_gen: v6e
topology: v6e:2x2x1
jax: 0.10.0
libtpu: 0.0.40
codegen_flags: <defaults>
</compile_context>

<pallas_src>
import math

import jax
import jax.numpy as jnp
from jax.experimental import pallas as pl
from jax.experimental.pallas import tpu as pltpu


def _round_up(n, m):
    return ((n + m - 1) // m) * m


def _mlp_kernel(x_ref,
                w1_ref, b1_ref,
                w2_ref, b2_ref,
                w3_ref, b3_ref,
                w4_ref, b4_ref,
                out_ref):
    """Fused 4-layer MLP forward for one batch tile, all in VMEM.

    Layer 1 runs in f32 (tiny K), layers 2/3 use bf16 MXU operands (weights
    pre-cast in the wrapper) with f32 accumulation, and the 32->1 head runs on
    the VPU (broadcast-mul + lane reduce) with sigmoid on the EUP.
    """
    x = x_ref[...]                                   # f32 (bm, D)

    # Layer 1: Linear + ReLU, full f32 (dropout = identity at inference).
    h1 = jnp.dot(x, w1_ref[...], preferred_element_type=jnp.float32) + b1_ref[...]
    h1 = jnp.maximum(h1, 0.0)

    # Layer 2: Linear + ReLU, bf16 operands / f32 accumulation.
    h2 = jnp.dot(h1.astype(jnp.bfloat16), w2_ref[...],
                 preferred_element_type=jnp.float32) + b2_ref[...]
    h2 = jnp.maximum(h2, 0.0)

    # Layer 3: Linear + ReLU, bf16 operands / f32 accumulation.
    h3 = jnp.dot(h2.astype(jnp.bfloat16), w3_ref[...],
                 preferred_element_type=jnp.float32) + b3_ref[...]
    h3 = jnp.maximum(h3, 0.0)

    # Output head (32 -> 1): VPU broadcast-multiply + lane reduction, then
    # sigmoid on the EUP.  w4_ref holds the weights as a (1, 32) f32 row.
    logits = jnp.sum(h3 * w4_ref[...], axis=-1, keepdims=True) + b4_ref[...]
    out_ref[...] = jax.nn.sigmoid(logits).astype(out_ref.dtype)


def heart_attack_predictor_forward(x, params, *, batch_tile=4096):
    """Run the fused MLP Pallas kernel.

    Args:
      x: (batch, input_dim) float32
      params: dict with w1..w4 of shape (in, out) and b1..b4 of shape (1, out)
      batch_tile: max rows per grid step (rounded to a multiple of 8).  The
        default is sized for v7x's 64 MiB VMEM; v5e/v6e can pass up to ~16384.

    Returns:
      (batch, 1) float32 probabilities.
    """
    B, D = x.shape

    # Rows per grid step: multiple of 8 (f32 sublane constraint), no larger
    # than the (8-rounded) batch itself.
    bm = max(8, min(int(batch_tile), _round_up(B, 8)))
    bm = _round_up(bm, 8)
    # Keep at least 2 grid steps when the batch allows it, so the "parallel"
    # axis can shard across both TensorCores on v7x (a 1-step grid leaves one
    # TC idle on this overhead-bound kernel).
    if B > 8:
        bm = min(bm, max(8, _round_up(pl.cdiv(B, 2), 8)))

    num_tiles = pl.cdiv(B, bm)   # ragged final tile handled by Pallas masking

    w1, b1 = params["w1"], params["b1"]
    # Pre-cast once: weights are DMA'd once (replicated blocks) but would be
    # re-cast on the VPU every grid step if cast in-kernel.
    w2 = params["w2"].astype(jnp.bfloat16)
    w3 = params["w3"].astype(jnp.bfloat16)
    b2, b3 = params["b2"], params["b3"]
    w4_row = params["w4"].reshape(1, -1)   # (32, 1) -> (1, 32), lane-oriented
    b4 = params["b4"]                      # (1, 1)

    def replicated(arr):
        # Whole-array block, same block index every grid step (fetched once).
        return pl.BlockSpec(arr.shape, lambda i: tuple(0 for _ in arr.shape))

    out = pl.pallas_call(
        _mlp_kernel,
        out_shape=jax.ShapeDtypeStruct((B, 1), jnp.float32),
        grid_spec=pltpu.PrefetchScalarGridSpec(
            num_scalar_prefetch=0,
            grid=(num_tiles,),
            in_specs=[
                pl.BlockSpec((bm, D), lambda i: (i, 0)),   # x batch tile
                replicated(w1), replicated(b1),
                replicated(w2), replicated(b2),
                replicated(w3), replicated(b3),
                replicated(w4_row), replicated(b4),
            ],
            out_specs=pl.BlockSpec((bm, 1), lambda i: (i, 0)),
        ),
        compiler_params=pltpu.CompilerParams(
            dimension_semantics=("parallel",),
            vmem_limit_bytes=48 * 1024 * 1024,
        ),
    )(x, w1, b1, w2, b2, w3, b3, w4_row, b4)

    return out


def init_params(key, input_dim, hidden_dims=(128, 64, 32)):
    """Xavier-uniform weights, zero biases (matches _initialize_weights)."""
    dims = [input_dim] + list(hidden_dims) + [1]
    params = {}
    for li in range(len(dims) - 1):
        fan_in, fan_out = dims[li], dims[li + 1]
        key, sub = jax.random.split(key)
        limit = math.sqrt(6.0 / (fan_in + fan_out))
        w = jax.random.uniform(sub, (fan_in, fan_out), jnp.float32, -limit, limit)
        params[f"w{li + 1}"] = w
        params[f"b{li + 1}"] = jnp.zeros((1, fan_out), jnp.float32)
    return params


def reference_forward(x, params):
    """Pure-JAX (f32) reference for correctness check."""
    h = x
    for li in range(1, 4):
        h = jnp.maximum(h @ params[f"w{li}"] + params[f"b{li}"], 0.0)
    logits = h @ params["w4"] + params["b4"]
    return jax.nn.sigmoid(logits)


if __name__ == "__main__":
    key = jax.random.PRNGKey(0)
    # Non-multiple-of-8 batch exercises the ragged-final-tile path, and with
    # the >=2-step cap the demo runs a 2-step "parallel" grid.
    batch, input_dim = 20, 16

    pkey, xkey = jax.random.split(key)
    params = init_params(pkey, input_dim)
    x = jax.random.normal(xkey, (batch, input_dim), jnp.float32)

    out = heart_attack_predictor_forward(x, params)
    out = jax.block_until_ready(out)

    ref = reference_forward(x, params)
    assert out.shape == (batch, 1), out.shape
    assert bool(jnp.all(jnp.isfinite(out)))
    max_err = float(jnp.max(jnp.abs(out - ref)))
    assert max_err < 2e-2, max_err   # layers 2/3 use bf16 MXU operands
    print("KERNEL_OK")
</pallas_src>

<mosaic_0001>
module attributes {stable_mosaic.version = 11 : i64} {
  func.func @_mlp_kernel(%arg0: i32, %arg1: memref<16x16xf32, #tpu.memory_space<vmem>>, %arg2: memref<16x128xf32, #tpu.memory_space<vmem>>, %arg3: memref<1x128xf32, #tpu.memory_space<vmem>>, %arg4: memref<128x64xbf16, #tpu.memory_space<vmem>>, %arg5: memref<1x64xf32, #tpu.memory_space<vmem>>, %arg6: memref<64x32xbf16, #tpu.memory_space<vmem>>, %arg7: memref<1x32xf32, #tpu.memory_space<vmem>>, %arg8: memref<1x32xf32, #tpu.memory_space<vmem>>, %arg9: memref<1x1xf32, #tpu.memory_space<vmem>>, %arg10: memref<16x1xf32, #tpu.memory_space<vmem>>) attributes {dimension_semantics = [#tpu.dimension_semantics<parallel>], iteration_bounds = array<i64: 2>, scalar_prefetch = 0 : i64, scratch_operands = 0 : i64, tpu.core_type = #tpu.core_type<tc>, window_params = [{transform_indices = @transform_0, window_bounds = array<i64: 16, 16>}, {pipeline_mode = #tpu.pipeline_mode<synchronous>, transform_indices = @transform_1, window_bounds = array<i64: 16, 128>}, {pipeline_mode = #tpu.pipeline_mode<synchronous>, transform_indices = @transform_2, window_bounds = array<i64: 1, 128>}, {pipeline_mode = #tpu.pipeline_mode<synchronous>, transform_indices = @transform_3, window_bounds = array<i64: 128, 64>}, {pipeline_mode = #tpu.pipeline_mode<synchronous>, transform_indices = @transform_4, window_bounds = array<i64: 1, 64>}, {pipeline_mode = #tpu.pipeline_mode<synchronous>, transform_indices = @transform_5, window_bounds = array<i64: 64, 32>}, {pipeline_mode = #tpu.pipeline_mode<synchronous>, transform_indices = @transform_6, window_bounds = array<i64: 1, 32>}, {pipeline_mode = #tpu.pipeline_mode<synchronous>, transform_indices = @transform_7, window_bounds = array<i64: 1, 32>}, {pipeline_mode = #tpu.pipeline_mode<synchronous>, transform_indices = @transform_8, window_bounds = array<i64: 1, 1>}, {transform_indices = @transform_9, window_bounds = array<i64: 16, 1>}]} {
    %c0 = arith.constant 0 : index
    %c0_0 = arith.constant 0 : index
    %0 = vector.load %arg1[%c0, %c0_0] : memref<16x16xf32, #tpu.memory_space<vmem>>, vector<16x16xf32>
    %c0_1 = arith.constant 0 : index
    %c0_2 = arith.constant 0 : index
    %1 = vector.load %arg2[%c0_1, %c0_2] : memref<16x128xf32, #tpu.memory_space<vmem>>, vector<16x128xf32>
    %cst = arith.constant dense<0.000000e+00> : vector<16x128xf32>
    %2 = tpu.matmul %0, %1, %cst {dimension_numbers = #tpu.dot_dimension_numbers<[1], [0], [0], [1], [0, 0, 1, 1], [], []>} : vector<16x16xf32>, vector<16x128xf32>, vector<16x128xf32> -> vector<16x128xf32>
    %c0_3 = arith.constant 0 : index
    %c0_4 = arith.constant 0 : index
    %3 = vector.load %arg3[%c0_3, %c0_4] : memref<1x128xf32, #tpu.memory_space<vmem>>, vector<1x128xf32>
    %4 = vector.broadcast %3 : vector<1x128xf32> to vector<16x128xf32>
    %5 = arith.addf %2, %4 : vector<16x128xf32>
    %cst_5 = arith.constant 0.000000e+00 : f32
    %6 = vector.broadcast %cst_5 : f32 to vector<16x128xf32>
    %7 = arith.maximumf %5, %6 : vector<16x128xf32>
    %8 = arith.truncf %7 : vector<16x128xf32> to vector<16x128xbf16>
    %c0_6 = arith.constant 0 : index
    %c0_7 = arith.constant 0 : index
    %9 = vector.load %arg4[%c0_6, %c0_7] : memref<128x64xbf16, #tpu.memory_space<vmem>>, vector<128x64xbf16>
    %cst_8 = arith.constant dense<0.000000e+00> : vector<16x64xf32>
    %10 = tpu.matmul %8, %9, %cst_8 {dimension_numbers = #tpu.dot_dimension_numbers<[1], [0], [0], [1], [0, 0, 1, 1], [], []>} : vector<16x128xbf16>, vector<128x64xbf16>, vector<16x64xf32> -> vector<16x64xf32>
    %c0_9 = arith.constant 0 : index
    %c0_10 = arith.constant 0 : index
    %11 = vector.load %arg5[%c0_9, %c0_10] : memref<1x64xf32, #tpu.memory_space<vmem>>, vector<1x64xf32>
    %12 = vector.broadcast %11 : vector<1x64xf32> to vector<16x64xf32>
    %13 = arith.addf %10, %12 : vector<16x64xf32>
    %cst_11 = arith.constant 0.000000e+00 : f32
    %14 = vector.broadcast %cst_11 : f32 to vector<16x64xf32>
    %15 = arith.maximumf %13, %14 : vector<16x64xf32>
    %16 = arith.truncf %15 : vector<16x64xf32> to vector<16x64xbf16>
    %c0_12 = arith.constant 0 : index
    %c0_13 = arith.constant 0 : index
    %17 = vector.load %arg6[%c0_12, %c0_13] : memref<64x32xbf16, #tpu.memory_space<vmem>>, vector<64x32xbf16>
    %cst_14 = arith.constant dense<0.000000e+00> : vector<16x32xf32>
    %18 = tpu.matmul %16, %17, %cst_14 {dimension_numbers = #tpu.dot_dimension_numbers<[1], [0], [0], [1], [0, 0, 1, 1], [], []>} : vector<16x64xbf16>, vector<64x32xbf16>, vector<16x32xf32> -> vector<16x32xf32>
    %c0_15 = arith.constant 0 : index
    %c0_16 = arith.constant 0 : index
    %19 = vector.load %arg7[%c0_15, %c0_16] : memref<1x32xf32, #tpu.memory_space<vmem>>, vector<1x32xf32>
    %20 = vector.broadcast %19 : vector<1x32xf32> to vector<16x32xf32>
    %21 = arith.addf %18, %20 : vector<16x32xf32>
    %cst_17 = arith.constant 0.000000e+00 : f32
    %22 = vector.broadcast %cst_17 : f32 to vector<16x32xf32>
    %23 = arith.maximumf %21, %22 : vector<16x32xf32>
    %c0_18 = arith.constant 0 : index
    %c0_19 = arith.constant 0 : index
    %24 = vector.load %arg8[%c0_18, %c0_19] : memref<1x32xf32, #tpu.memory_space<vmem>>, vector<1x32xf32>
    %25 = vector.broadcast %24 : vector<1x32xf32> to vector<16x32xf32>
    %26 = arith.mulf %23, %25 : vector<16x32xf32>
    %cst_20 = arith.constant dense<0.000000e+00> : vector<16xf32>
    %27 = vector.multi_reduction <add>, %26, %cst_20 [1] : vector<16x32xf32> to vector<16xf32>
    %28 = vector.shape_cast %27 : vector<16xf32> to vector<16x1xf32>
    %c0_21 = arith.constant 0 : index
    %c0_22 = arith.constant 0 : index
    %29 = vector.load %arg9[%c0_21, %c0_22] : memref<1x1xf32, #tpu.memory_space<vmem>>, vector<1x1xf32>
    %30 = vector.broadcast %29 : vector<1x1xf32> to vector<16x1xf32>
    %31 = arith.addf %28, %30 : vector<16x1xf32>
    %32 = arith.negf %31 : vector<16x1xf32>
    %33 = math.exp %32 : vector<16x1xf32>
    %cst_23 = arith.constant 1.000000e+00 : f32
    %34 = vector.broadcast %cst_23 : f32 to vector<16x1xf32>
    %35 = arith.addf %34, %33 : vector<16x1xf32>
    %36 = arith.divf %34, %35 : vector<16x1xf32>
    %c0_24 = arith.constant 0 : index
    %c0_25 = arith.constant 0 : index
    %37 = vector.load %arg10[%c0_24, %c0_25] : memref<16x1xf32, #tpu.memory_space<vmem>>, vector<16x1xf32>
    tpu.vector_store %arg10[%c0_24, %c0_25], %36 {strides = array<i32>} : memref<16x1xf32, #tpu.memory_space<vmem>>, vector<16x1xf32>,
    return
  }
  func.func @transform_0(%arg0: i32) -> (i32, i32) {
    %c0_i32 = arith.constant 0 : i32
    %c0_i32_0 = arith.constant 0 : i32
    return %arg0, %c0_i32 : i32, i32
  }
  func.func @transform_1(%arg0: i32) -> (i32, i32) {
    %c0_i32 = arith.constant 0 : i32
    %c0_i32_0 = arith.constant 0 : i32
    %c0_i32_1 = arith.constant 0 : i32
    return %c0_i32, %c0_i32_0 : i32, i32
  }
  func.func @transform_2(%arg0: i32) -> (i32, i32) {
    %c0_i32 = arith.constant 0 : i32
    %c0_i32_0 = arith.constant 0 : i32
    %c0_i32_1 = arith.constant 0 : i32
    return %c0_i32, %c0_i32_0 : i32, i32
  }
  func.func @transform_3(%arg0: i32) -> (i32, i32) {
    %c0_i32 = arith.constant 0 : i32
    %c0_i32_0 = arith.constant 0 : i32
    %c0_i32_1 = arith.constant 0 : i32
    return %c0_i32, %c0_i32_0 : i32, i32
  }
  func.func @transform_4(%arg0: i32) -> (i32, i32) {
    %c0_i32 = arith.constant 0 : i32
    %c0_i32_0 = arith.constant 0 : i32
    %c0_i32_1 = arith.constant 0 : i32
    return %c0_i32, %c0_i32_0 : i32, i32
  }
  func.func @transform_5(%arg0: i32) -> (i32, i32) {
    %c0_i32 = arith.constant 0 : i32
    %c0_i32_0 = arith.constant 0 : i32
    %c0_i32_1 = arith.constant 0 : i32
    return %c0_i32, %c0_i32_0 : i32, i32
  }
  func.func @transform_6(%arg0: i32) -> (i32, i32) {
    %c0_i32 = arith.constant 0 : i32
    %c0_i32_0 = arith.constant 0 : i32
    %c0_i32_1 = arith.constant 0 : i32
    return %c0_i32, %c0_i32_0 : i32, i32
  }
  func.func @transform_7(%arg0: i32) -> (i32, i32) {
    %c0_i32 = arith.constant 0 : i32
    %c0_i32_0 = arith.constant 0 : i32
    %c0_i32_1 = arith.constant 0 : i32
    return %c0_i32, %c0_i32_0 : i32, i32
  }
  func.func @transform_8(%arg0: i32) -> (i32, i32) {
    %c0_i32 = arith.constant 0 : i32
    %c0_i32_0 = arith.constant 0 : i32
    %c0_i32_1 = arith.constant 0 : i32
    return %c0_i32, %c0_i32_0 : i32, i32
  }
  func.func @transform_9(%arg0: i32) -> (i32, i32) {
    %c0_i32 = arith.constant 0 : i32
    %c0_i32_0 = arith.constant 0 : i32
    return %arg0, %c0_i32 : i32, i32
  }
}

</mosaic_0001>

<bundles_post_ra>
// kernel: tpu_custom_call.1
= control target key start
LH: loop header
LB: loop body
LE: loop exit
PB: predicated region body
PF: predicated region fallthrough
CT: control target
= control target key end

     0   :  { %s1410_s0 = inlined_call_operand.vmem [shape: f32[20,16], index: 0, kind: input, shape index: {}]   ;;  %s1411_s1 = inlined_call_operand.vmem [shape: f32[16,128], index: 1, kind: input, shape index: {}]   ;;  %s1412_s2 = inlined_call_operand.vmem [shape: f32[1,128], index: 2, kind: input, shape index: {}]   ;;  %s1413_s3 = inlined_call_operand.vmem [shape: bf16[128,64], index: 3, kind: input, shape index: {}]   ;;  %s1414_s4 = inlined_call_operand.vmem [shape: f32[1,64], index: 4, kind: input, shape index: {}]   ;;  %s1415_s5 = inlined_call_operand.vmem [shape: bf16[64,32], index: 5, kind: input, shape index: {}]   ;;  %s1416_s6 = inlined_call_operand.vmem [shape: f32[1,32], index: 6, kind: input, shape index: {}]   ;;  %s1417_s7 = inlined_call_operand.vmem [shape: f32[1,32], index: 7, kind: input, shape index: {}]   ;;  %s1418_s8 = inlined_call_operand.<no memory space> [shape: f32[1,1], index: 8, kind: input, shape index: {}]   ;;  %s1419_s9 = inlined_call_operand.vmem [shape: f32[20,1], index: 9, kind: output, shape index: {}]  }
   0x1   :  { %v14_v0 = vstv %s1418_s8 }
   0x2   :  { %15 = vst [vmem:[#allocation2] sm:$0x1] %v14_v0 }
   0x3   :  { %s1273_s11 = smov 0   ;;  %s1275_s12 = smov 0  }
   0x4   :  { %s1277_s13 = smov 0  }
   0x5 LB: > { %s1286_s8 = sadd.s32 4294967295, %s1184_s13   ;;  %s1288_s14 = sadd.s32 1, %s1184_s13   ;;  %s1184_s13 = sphi %s1277_s13, %s1423_s13   ;;  %s1180_s12 = sphi %s1275_s12, %s1422_s12   ;;  %s1176_s11 = sphi %s1273_s11, %s1421_s11  }
   0x6   : > { %s219_s15 = ssub.s32 %s1184_s13, %s1288_s14  ;;  %s222_s16 = sadd.s32 1, %s1180_s12 }
   0x7   : > { %p220_p0 = scmp.eq.s32.totalorder %s219_s15, 0  ;;  %p232_p1 = scmp.ne.s32.totalorder %s1180_s12, %s1176_s11 }
   0x8   : > { %p233_p2 = scmp.eq.s32.totalorder %s1286_s8, 1  ;;  %p917_p3 = scmp.ge.s32.totalorder %s1184_s13, 1 }
   0x9   : > { %s1296_s17 = scalar_select %p220_p0, %s1180_s12, %s222_s16  }
   0xa   : > { %p1298_p4 = por %p233_p2, %p232_p1  ;;  %p298_p5 = scmp.lt.s32.totalorder %s1184_s13, 3 }
   0xc   : > { %p299_p6 = pnand %p917_p3, %p298_p5 }
   0xd   : > { %s1309_s23 = sshll.u32 (!%p299_p6), %s1286_s8, 1  ;;  %s334_s10 = sand.u32 (!%p299_p6), 1, %s1176_s11  }
   0xe   : > { %302 = sbr.rel (%p299_p6) target bundleno = 845 (0x34d), region = 56  ;;  %p342_p7 = scmp.lt.s32.totalorder (!%p299_p6), %s1309_s23, 2 }
  0x13   : > { %v360_v1 = vld [vmem:[%s1411_s1 + $0x8] sm:$0xff]  ;;  %v359_v2 = vld [vmem:[%s1411_s1] sm:$0xff]  ;;  %v1110_v3 = vld [vmem:[%s1413_s3 + $0x38] sm:$0xff]   ;;  %v1218_v4 = vmov 0.0   ;;  %s343_s28 = scalar_select %p342_p7, %s1309_s23, 2  ;;  %vm368_vm0 = vcmask 130048  }
  0x14   : > { %981 = vmatprep.subr.mxu0 %v360_v1  ;;  %988 = vmatprep.subr.bf16.mxu1 %v1218_v4  ;;  %v1111_v5 = vld [vmem:[%s1413_s3 + $0x30] sm:$0xff]   ;;  %v1112_v6 = vld [vmem:[%s1413_s3 + $0x28] sm:$0xff]   ;;  %v1113_v9 = vld [vmem:[%s1413_s3 + $0x20] sm:$0xff]   ;;  %vm1219_vm1 = vmmov 0   ;;  %vm607_vm2 = vcmask 523264   ;;  %vm663_vm3 = vcmask 261120  }
  0x15   : > { %982 = vmatpush3.msra.mxu0 %v360_v1  ;;  %989 = vmatpush3.bf16.msra.mxu1 %v1110_v3  ;;  %s920_s29 = sshll.u32 %s343_s28, 3  ;;  %v1114_v10 = vld [vmem:[%s1413_s3 + $0x18] sm:$0xff]   ;;  %v1115_v11 = vld [vmem:[%s1413_s3 + $0x10] sm:$0xff]   ;;  %v1116_v12 = vld [vmem:[%s1413_s3 + $0x8] sm:$0xff]   ;;  %vm691_vm4 = vcmask 7168   ;;  %s702_s16 = ssub.s32 (%p1298_p4), 3, %s1309_s23 }
  0x16   : > { %983 = vmatprep.subr.mxu0 %v359_v2  ;;  %990 = vmatprep.subr.bf16.mxu1 %v1218_v4  ;;  %s345_s13 = scalar_lea.vmem %s1410_s0, %s920_s29  ;;  %v1117_v13 = vld [vmem:[%s1413_s3] sm:$0xff]   ;;  %v1118_v14 = vld [vmem:[%s1415_s5 + $0x18] sm:$0xff]   ;;  %v1119_v23 = vld [vmem:[%s1415_s5 + $0x10] sm:$0xff]   ;;  %s960_s19 = sshll.u32 (%p1298_p4), %s1286_s8, 4 }
  0x17   : > { %984 = vmatpush3.msra.mxu0 %v359_v2  ;;  %v357_v7 = vld [vmem:[%s345_s13] sm:$0xff]  ;;  %v358_v8 = vld [vmem:[%s345_s13 + $0x8] sm:$0xff]  ;;  %1004 = vmatprep.mubr.msk.bf16.mxu1 %vm1219_vm1, %v1218_v4  ;;  %s918_s13 = sshll.u32 %s334_s10, 4  ;;  %p703_p8 = scmp.lt.s32.totalorder (%p1298_p4), %s702_s16, 2 }
  0x18   : > { %1008 = vmatprep.subr.bf16.mxu0 %v1218_v4  ;;  %985 = vmatprep.mubr.msk.f32.mxu0 %vm368_vm0, %v357_v7  ;;  %v921_v15 = vld [vmem:[%s1412_s2] ss:$0 sm:$0xff]  ;;  %v1120_v24 = vld [vmem:[%s1415_s5 + $0x8] sm:$0xff]   ;;  %s1365_s15 = scalar_lea.vmem [#allocation3], %s918_s13   ;;  %s1376_s21 = scalar_lea.vmem (%p1298_p4), %s1419_s9, %s960_s19  }
  0x19   : > { %991 = vmatpush3.bf16.msra.mxu1 %v1111_v5  ;;  %986 = vmatmul.mubr.msk.f32.vlgmr.msra.gmra.mxu0 %vm368_vm0, %v358_v8  ;;  %v1121_v25 = vld [vmem:[%s1415_s5] sm:$0xff]  }
  0x1a   : > { %992 = vmatprep.subr.bf16.mxu1 %v1218_v4  ;;  %1016 = vmatprep.mubr.msk.bf16.mxu0 %vm1219_vm1, %v1218_v4  ;;  %v924_v26 = vld [vmem:[%s1414_s4] ss:$0 sm:$0xff] }
  0x1b   : > { %1009 = vmatpush3.bf16.msra.mxu0 %v1118_v14  ;;  %v933_v36 = vld [vmem:[%s1416_s6] ss:$0 sm:$0xff] }
  0x1c   : > { %1010 = vmatprep.subr.bf16.mxu0 %v1218_v4  ;;  %v939_v40 = vld [vmem:[%s1417_s7] ss:$0 sm:$0xff] }
  0x1d   : > { %993 = vmatpush3.bf16.msra.mxu1 %v1112_v6  ;;  %v940_v50 = vld [vmem:[#allocation2] ss:$0 sm:$0xff] }
  0x1e   : > { %994 = vmatprep.subr.bf16.mxu1 %v1218_v4 }
  0x1f   : > { %1011 = vmatpush3.bf16.msra.mxu0 %v1119_v23 }
  0x20   : > { %1012 = vmatprep.subr.bf16.mxu0 %v1218_v4 }
  0x21   : > { %995 = vmatpush3.bf16.msra.mxu1 %v1113_v9 }
  0x22   : > { %996 = vmatprep.subr.bf16.mxu1 %v1218_v4 }
  0x23   : > { %1013 = vmatpush3.bf16.msra.mxu0 %v1120_v24 }
  0x24   : > { %1014 = vmatprep.subr.bf16.mxu0 %v1218_v4 }
  0x25   : > { %997 = vmatpush3.bf16.msra.mxu1 %v1114_v10 }
  0x26   : > { %998 = vmatprep.subr.bf16.mxu1 %v1218_v4 }
  0x27   : > { %1015 = vmatpush3.bf16.msra.mxu0 %v1121_v25 }
  0x29   : > { %999 = vmatpush3.bf16.msra.mxu1 %v1115_v11 }
  0x2a   : > { %1000 = vmatprep.subr.bf16.mxu1 %v1218_v4 }
  0x2d   : > { %1001 = vmatpush3.bf16.msra.mxu1 %v1116_v12 }
  0x2e   : > { %1002 = vmatprep.subr.bf16.mxu1 %v1218_v4 }
  0x31   : > { %1003 = vmatpush3.bf16.msra.mxu1 %v1117_v13 }
  0xd9   : > { %v987_v16 = vpop.f32.mrf.mxu0 }
  0xda   : > { %v447_v17 = vadd.f32 %v987_v16, %v921_v15 }
  0xdb   : > { %v441_v18 = vpop.f32.mrf.mxu0 }
  0xdc   : > { %v442_v19 = vadd.f32 %v921_v15, %v441_v18  ;;  %v451_v20 = vmax.f32 %v447_v17, 0.0 }
  0xde   : > { %v450_v21 = vmax.f32 %v442_v19, 0.0 }
  0xe0   : > { %v452_v22 = vpack.c.bf16 %v451_v20, %v450_v21 }
  0xe2   : > { %1005 = vmatmul.mubr.bf16.vlgmr.msra.gmra.mxu1 %v452_v22 }
 0x1a2   : > { %v558_v27 = vpop.f32.mrf.mxu1 }
 0x1a3   : > { %v559_v29 = vadd.f32 %v924_v26, %v558_v27 }
 0x1a4   : > { %v1006_v28 = vpop.f32.mrf.mxu1 }
 0x1a5   : > { %v565_v33 = vmax.f32 %v559_v29, 0.0 }
 0x1a6   : > { %v561_v30 = vpop.f32.mrf.mxu1 }
 0x1a7   : > { %v562_v31 = vadd.f32 %v924_v26, %v561_v30 }
 0x1a8   : > { %v1007_v32 = vpop.f32.mrf.mxu1 }
 0x1a9   : > { %v566_v34 = vmax.f32 %v562_v31, 0.0 }
 0x1ab   : > { %v567_v35 = vpack.c.bf16 %v566_v34, %v565_v33 }
 0x1ad   : > { %1017 = vmatmul.mubr.msk.bf16.vlgmr.msra.gmra.mxu0 %vm607_vm2, %v567_v35 }
 0x26d   : > { %v645_v37 = vpop.f32.mrf.mxu0 }
 0x26e   : > { %v646_v38 = vadd.f32 %v933_v36, %v645_v37 }
 0x26f   : > { %v1018_v39 = vpop.f32.mrf.mxu0 }
 0x270   : > { %v652_v41 = vmax.f32 %v646_v38, 0.0 }
 0x271   : > { %v648_v42 = vpop.f32.mrf.mxu0 }
 0x272   : > { %v649_v43 = vadd.f32 %v933_v36, %v648_v42  ;;  %v661_v44 = vmul.f32 %v939_v40, %v652_v41 }
 0x273   : > { %v1019_v45 = vpop.f32.mrf.mxu0 }
 0x274   : > { %v653_v46 = vmax.f32 %v649_v43, 0.0  ;;  %v664_v47 = vsel %vm663_vm3, %v661_v44, 0.0 }
 0x275   : > { %665 = vadd.xlane.f32.xlu0 %v664_v47 }
 0x276   : > { %v662_v48 = vmul.f32 %v939_v40, %v653_v46 }
 0x278   : > { %v667_v49 = vsel %vm663_vm3, %v662_v48, 0.0 }
 0x279   : > { %668 = vadd.xlane.f32.xlu0 %v667_v49 }
 0x2fe   : > { %v666_v51 = vpop.xlane.xlu0 %665 }
 0x2ff   : > { %v677_v52 = vadd.f32 %v940_v50, %v666_v51 }
 0x301   : > { %v941_v53 = vmul.f32 -1.442695, %v677_v52 }
 0x302   : > { %v669_v54 = vpop.xlane.xlu0 %668 }
 0x303   : > { %1122 = vpow2.f32 %v941_v53  ;;  %v678_v55 = vadd.f32 %v940_v50, %v669_v54 }
 0x305   : > { %v942_v56 = vmul.f32 -1.442695, %v678_v55 }
 0x307   : > { %1124 = vpow2.f32 %v942_v56 }
 0x310   : > { %v1123_v57 = vpop.eup %1122 }
 0x311   : > { %v685_v58 = vadd.f32 1.0, %v1123_v57 }
 0x313   : > { %1126 = vrcp.f32 %v685_v58 }
 0x314   : > { %v1125_v59 = vpop.eup %1124 }
 0x315   : > { %v686_v60 = vadd.f32 1.0, %v1125_v59 }
 0x317   : > { %1128 = vrcp.f32 %v686_v60 }
 0x320   : > { %v1127_v61 = vpop.eup %1126 }
 0x321   : > { %692 = vst.msk [vmem:[%s1365_s15] sm:$0xff] %vm691_vm4, %v1127_v61  ;;  %700 = sbr.rel (!%p1298_p4) target bundleno = 845 (0x34d), region = 60 }
 0x324   : > { %v1129_v62 = vpop.eup %1128 }
 0x325   : > { %693 = vst.msk [vmem:[%s1365_s15 + $0x8] sm:$0xff] %vm691_vm4, %v1129_v62 }
 0x326   : > { %s1425_s16 = smov (!%p703_p8, %s702_s16), 2 }
 0x327   : > { %s945_s22 = sshll.u32 %s1425_s16, 7 }
 0x328   : > { %p948_p9 = scmp.eq.s32.totalorder %s945_s22, 0 }
 0x329   : > { %s1382_s24 = sshrl.u32 (!%p948_p9), %s1425_s16, 1 }
 0x32a   : > { %711 = sbr.rel (%p948_p9) target bundleno = 845 (0x34d), region = 64  ;;  %p949_p10 = scmp.le.s32.totalorder (!%p948_p9), %s1382_s24, 0 }
 0x32f   : > { %870 = sbr.rel (%p949_p10) target bundleno = 828 (0x33c), region = 140  ;;  %s1186_s8 = smov (!%p949_p10), %s1376_s21  }
 0x330   : > { %s1190_s18 = smov (!%p949_p10), %s1365_s15   ;;  %s1194_s23 = smov (!%p949_p10), 0  }
 0x331   : > { %s1198_s25 = smov (!%p949_p10), 0  }
 0x334 LB: >> { %v776_v63 = vld [vmem:[%s1192_s18] sm:$0xff]  ;;  %v778_v0 = vld [vmem:[%s1192_s18 + $0x8] sm:$0xff]  ;;  %s780_s26 = sadd.s32 1, %s1196_s23  ;;  %s770_s25 = sadd.s32 1, %s1200_s25   ;;  %s1200_s25 = sphi %s1198_s25, %s770_s25   ;;  %s1196_s23 = sphi %s1194_s23, %s1195_s23   ;;  %s1192_s18 = sphi %s1190_s18, %s785_s18   ;;  %s1188_s8 = sphi %s1186_s8, %s786_s8  }
 0x335   : >> { %777 = vst [vmem:[%s1188_s8] sm:$0xff] %v776_v63  ;;  %779 = vst [vmem:[%s1188_s8 + $0x8] sm:$0xff] %v778_v0  ;;  %p781_p11 = scmp.ge.s32.totalorder %s780_s26, %s1382_s24  ;;  %p769_p12 = scmp.ge.s32.totalorder %s770_s25, %s1382_s24 }
 0x337   : >> { %s1427_s26 = smov (%p781_p11, %s780_s26), 0  ;;  %772 = sbr.rel (!%p769_p12) target bundleno = 820 (0x334), region = 146 }
 0x338   : >> { %s950_s27 = sshll.u32 %s1427_s26, 4  ;;  %s1195_s23 = smov %s1427_s26  }
 0x339   : >> { %s785_s18 = scalar_lea.vmem %s1365_s15, %s950_s27 [#allocation3]   ;;  %s786_s8 = scalar_lea.vmem %s1376_s21, %s950_s27  }
 0x33c PF: > { %s1392_s28 = sand.u32 1, %s1425_s16   ;;  %s961_s29 = sshll.u32 %s1382_s24, 4 }
 0x33d   : > { %s791_s30 = scalar_lea.vmem %s1365_s15, %s961_s29 [#allocation3]   ;;  %s793_s10 = scalar_lea.vmem %s1376_s21, %s961_s29  }
 0x33e   : > { %p955_p13 = scmp.le.s32.totalorder %s1392_s28, 0 }
 0x33f   : > { %s1202_s13 = smov (!%p955_p13), %s793_s10   ;;  %s1206_s19 = smov (!%p955_p13), %s791_s30  }
 0x340   : > { %884 = sbr.rel (%p955_p13) target bundleno = 845 (0x34d), region = 151  ;;  %s1210_s20 = smov (!%p955_p13), 0  }
 0x341   : > { %s1214_s11 = smov (!%p955_p13), 0  }
 0x345 LB: >> { %v803_v1 = vld [vmem:[%s1208_s19] sm:$0xff]  ;;  %s805_s16 = sadd.s32 1, %s1212_s20  ;;  %s797_s11 = sadd.s32 1, %s1216_s11   ;;  %s1216_s11 = sphi %s1214_s11, %s797_s11   ;;  %s1212_s20 = sphi %s1210_s20, %s1211_s20   ;;  %s1208_s19 = sphi %s1206_s19, %s810_s19   ;;  %s1204_s13 = sphi %s1202_s13, %s811_s13  }
 0x346   : >> { %804 = vst [vmem:[%s1204_s13] sm:$0xff] %v803_v1  ;;  %p806_p0 = scmp.ge.s32.totalorder %s805_s16, %s1392_s28  ;;  %p796_p1 = scmp.ge.s32.totalorder %s797_s11, %s1392_s28 }
 0x348   : >> { %s1429_s16 = smov (%p806_p0, %s805_s16), 0  ;;  %799 = sbr.rel (!%p796_p1) target bundleno = 837 (0x345), region = 157 }
 0x349   : >> { %s956_s15 = sshll.u32 %s1429_s16, 3  ;;  %s1211_s20 = smov %s1429_s16  }
 0x34a   : >> { %s810_s19 = scalar_lea.vmem %s791_s30, %s956_s15 [#allocation3]   ;;  %s811_s13 = scalar_lea.vmem %s793_s10, %s956_s15  }
 0x34d PF: > { %p18_p2 = scmp.ge.s32.totalorder %s1288_s14, 4   ;;  %s1421_s11 = smov %s1180_s12 }
 0x34e   : > { %s1422_s12 = smov %s1296_s17  ;;  %s1423_s13 = smov %s1288_s14 }
 0x34f   :  { %20 = sbr.rel (!%p18_p2) target bundleno = 5 (0x5), region = 168 }

</bundles_post_ra>
